<compile_context>
chip_gen: v7x
topology: tpu7x:2x2x1
jax: 0.10.0
libtpu: 0.0.40
codegen_flags: <defaults>
</compile_context>

<pallas_src>
import jax
import jax.numpy as jnp
from jax.experimental import pallas as pl
from jax.experimental.pallas import tpu as pltpu


def _fused_kernel(x_ref, w_ref, b_ref, o_ref):
    # x_ref: (B, S, D)   -- raw input, permute folded into the kernel
    # w_ref: (S, O)      -- linear weight, pre-transposed once in the wrapper
    # b_ref: (1, 1, O)   -- linear bias
    # o_ref: (B, D, O)   -- softmax(relu(tanh(x)).permute(0,2,1) @ w + b, axis=-1)
    S = x_ref.shape[1]

    # relu(tanh(.)) -- elementwise, commutes with the permute
    x = jnp.maximum(jnp.tanh(x_ref[...]), 0.0)            # (B, S, D)
    xt = jnp.transpose(x, (0, 2, 1))                       # (B, D, S) in-kernel permute
    w = w_ref[...]                                         # (S, O)

    # S is tiny & static: contract over S with VPU broadcast-FMAs instead of
    # pushing a (2,2)x(2,4) matmul through the MXU.
    acc = xt[:, :, 0:1] * w[0:1, :][None, :, :]            # (B, D, O)
    for s in range(1, S):
        acc = acc + xt[:, :, s:s + 1] * w[s:s + 1, :][None, :, :]
    logits = acc + b_ref[...]                              # broadcast (1,1,O)

    # numerically-stable softmax over the last (lane) dim
    m = jnp.max(logits, axis=-1, keepdims=True)
    e = jnp.exp(logits - m)
    inv = pl.reciprocal(jnp.sum(e, axis=-1, keepdims=True), approx=True)
    o_ref[...] = (e * inv).astype(o_ref.dtype)


def model_forward(x1, weight, bias):
    """x1: (B, S, D) f32; weight: (O, S) f32 (torch layout); bias: (O,) f32."""
    B, S, D = x1.shape
    O = weight.shape[0]

    # One-time parameter prep (8 + 4 floats), not on the activation path.
    w_t = weight.T                       # (S, O)
    b3d = bias.reshape(1, 1, O)          # (1, 1, O)

    # Shapes are tiny -> single full-array VMEM block, no grid.
    # TODO(synk): at realistic sizes, tile the B*D row axis with a 1-D grid
    # ("parallel") and per-generation VMEM-sized blocks.
    return pl.pallas_call(
        _fused_kernel,
        out_shape=jax.ShapeDtypeStruct((B, D, O), jnp.float32),
        in_specs=[
            pl.BlockSpec(memory_space=pltpu.MemorySpace.VMEM),
            pl.BlockSpec(memory_space=pltpu.MemorySpace.VMEM),
            pl.BlockSpec(memory_space=pltpu.MemorySpace.VMEM),
        ],
        out_specs=pl.BlockSpec(memory_space=pltpu.MemorySpace.VMEM),
    )(x1, w_t, b3d)


def _reference(x1, weight, bias):
    x2 = jnp.maximum(jnp.tanh(x1), 0.0)
    x3 = jnp.transpose(x2, (0, 2, 1))
    logits = jnp.einsum("bds,os->bdo", x3, weight) + bias
    return jax.nn.softmax(logits, axis=-1)


if __name__ == "__main__":
    key = jax.random.PRNGKey(0)
    k_x, k_w, k_b = jax.random.split(key, 3)

    B, S, D = 1, 2, 2          # matches torch.randn(1, 2, 2)
    O = 4                      # out_features (linear layer undefined in torch __init__)

    x1 = jax.random.normal(k_x, (B, S, D), dtype=jnp.float32)
    bound = 1.0 / (S ** 0.5)   # mimic nn.Linear default uniform init
    weight = jax.random.uniform(k_w, (O, S), jnp.float32, -bound, bound)
    bias = jax.random.uniform(k_b, (O,), jnp.float32, -bound, bound)

    out = model_forward(x1, weight, bias)
    jax.block_until_ready(out)

    ref = _reference(x1, weight, bias)
    assert out.shape == (B, D, O)
    # tolerance accounts for the EUP approximate reciprocal in the softmax tail
    assert jnp.allclose(out, ref, atol=1e-3, rtol=1e-3)

    print("KERNEL_OK")
</pallas_src>

<mosaic_0001>
module attributes {stable_mosaic.version = 11 : i64} {
  func.func @_fused_kernel(%arg0: memref<1x2x2xf32, #tpu.memory_space<vmem>>, %arg1: memref<2x4xf32, #tpu.memory_space<vmem>>, %arg2: memref<1x1x4xf32, #tpu.memory_space<vmem>>, %arg3: memref<1x2x4xf32, #tpu.memory_space<vmem>>) attributes {dimension_semantics = [], scalar_prefetch = 0 : i64, scratch_operands = 0 : i64, tpu.core_type = #tpu.core_type<tc>} {
    %c0 = arith.constant 0 : index
    %c0_0 = arith.constant 0 : index
    %c0_1 = arith.constant 0 : index
    %0 = vector.load %arg0[%c0, %c0_0, %c0_1] : memref<1x2x2xf32, #tpu.memory_space<vmem>>, vector<1x2x2xf32>
    %1 = math.tanh %0 : vector<1x2x2xf32>
    %cst = arith.constant 0.000000e+00 : f32
    %2 = vector.broadcast %cst : f32 to vector<1x2x2xf32>
    %3 = arith.maximumf %1, %2 : vector<1x2x2xf32>
    %4 = tpu.transpose %3, [0, 2, 1] : vector<1x2x2xf32> -> vector<1x2x2xf32>
    %c0_2 = arith.constant 0 : index
    %c0_3 = arith.constant 0 : index
    %5 = vector.load %arg1[%c0_2, %c0_3] : memref<2x4xf32, #tpu.memory_space<vmem>>, vector<2x4xf32>
    %6 = vector.extract_strided_slice %4 {offsets = [0, 0, 0], sizes = [1, 2, 1], strides = [1, 1, 1]} : vector<1x2x2xf32> to vector<1x2x1xf32>
    %7 = vector.extract_strided_slice %5 {offsets = [0, 0], sizes = [1, 4], strides = [1, 1]} : vector<2x4xf32> to vector<1x4xf32>
    %8 = vector.shape_cast %7 : vector<1x4xf32> to vector<1x1x4xf32>
    %9 = vector.broadcast %6 : vector<1x2x1xf32> to vector<1x2x4xf32>
    %10 = vector.broadcast %8 : vector<1x1x4xf32> to vector<1x2x4xf32>
    %11 = arith.mulf %9, %10 : vector<1x2x4xf32>
    %12 = vector.extract_strided_slice %4 {offsets = [0, 0, 1], sizes = [1, 2, 1], strides = [1, 1, 1]} : vector<1x2x2xf32> to vector<1x2x1xf32>
    %13 = vector.extract_strided_slice %5 {offsets = [1, 0], sizes = [1, 4], strides = [1, 1]} : vector<2x4xf32> to vector<1x4xf32>
    %14 = vector.shape_cast %13 : vector<1x4xf32> to vector<1x1x4xf32>
    %15 = vector.broadcast %12 : vector<1x2x1xf32> to vector<1x2x4xf32>
    %16 = vector.broadcast %14 : vector<1x1x4xf32> to vector<1x2x4xf32>
    %17 = arith.mulf %15, %16 : vector<1x2x4xf32>
    %18 = arith.addf %11, %17 : vector<1x2x4xf32>
    %c0_4 = arith.constant 0 : index
    %c0_5 = arith.constant 0 : index
    %c0_6 = arith.constant 0 : index
    %19 = vector.load %arg2[%c0_4, %c0_5, %c0_6] : memref<1x1x4xf32, #tpu.memory_space<vmem>>, vector<1x1x4xf32>
    %20 = vector.broadcast %19 : vector<1x1x4xf32> to vector<1x2x4xf32>
    %21 = arith.addf %18, %20 : vector<1x2x4xf32>
    %cst_7 = arith.constant dense<0xFF800000> : vector<1x2xf32>
    %22 = vector.multi_reduction <maximumf>, %21, %cst_7 [2] : vector<1x2x4xf32> to vector<1x2xf32>
    %23 = vector.shape_cast %22 : vector<1x2xf32> to vector<1x2x1xf32>
    %24 = vector.broadcast %23 : vector<1x2x1xf32> to vector<1x2x4xf32>
    %25 = arith.subf %21, %24 : vector<1x2x4xf32>
    %26 = math.exp %25 : vector<1x2x4xf32>
    %cst_8 = arith.constant dense<0.000000e+00> : vector<1x2xf32>
    %27 = vector.multi_reduction <add>, %26, %cst_8 [2] : vector<1x2x4xf32> to vector<1x2xf32>
    %28 = vector.shape_cast %27 : vector<1x2xf32> to vector<1x2x1xf32>
    %29 = tpu.reciprocal %28 {approx = true} : vector<1x2x1xf32> -> vector<1x2x1xf32>
    %30 = vector.broadcast %29 : vector<1x2x1xf32> to vector<1x2x4xf32>
    %31 = arith.mulf %26, %30 : vector<1x2x4xf32>
    %c0_9 = arith.constant 0 : index
    %c0_10 = arith.constant 0 : index
    %c0_11 = arith.constant 0 : index
    %32 = vector.load %arg3[%c0_9, %c0_10, %c0_11] : memref<1x2x4xf32, #tpu.memory_space<vmem>>, vector<1x2x4xf32>
    tpu.vector_store %arg3[%c0_9, %c0_10, %c0_11], %31 {strides = array<i32>} : memref<1x2x4xf32, #tpu.memory_space<vmem>>, vector<1x2x4xf32>,
    return
  }
}

</mosaic_0001>

<bundles_post_ra>
// kernel: tpu_custom_call.1
= control target key start
LH: loop header
LB: loop body
LE: loop exit
PB: predicated region body
PF: predicated region fallthrough
CT: control target
= control target key end

     0   :  { %8 = vsyncpa [#allocation3], 0  ;;  %s239_s0 = inlined_call_operand.hbm [shape: f32[1,2,2], index: 0, kind: input, shape index: {}]   ;;  %s240_s1 = inlined_call_operand.vmem [shape: f32[2,4], index: 1, kind: input, shape index: {}]   ;;  %s241_s2 = inlined_call_operand.vmem [shape: f32[1,1,4], index: 2, kind: input, shape index: {}]   ;;  %s242_s3 = inlined_call_operand.hbm [shape: f32[1,2,4], index: 3, kind: output, shape index: {}]  }
   0x1   :  { %9 = vsyncpa [#allocation4], 0  ;;  %s182_s12 = smov [#allocation2]   ;;  %s134_s16 = scalar_lea.hbm %s239_s0, 32 }
   0x2   :  { %s16_s13 = sshll.u32 %s182_s12, 4  ;;  %p135_p0 = scmp.ne.s32.totalorder %s239_s0, %s134_s16  ;;  %s17_s13 = int_to_ptr.vmem [resolvable:$true] %s16_s13 }
   0x3   :  { %p138_p1 = scmp.lt.u32.totalorder %s134_s16, %s239_s0 }
   0x5   :  { %p140_p2 = pnand %p138_p1, %p135_p0 }
   0x7   :  { %143 = shalt.err (!%p140_p2)
}
   0x8   :  { %s144_s21 = scalar_lea.vmem %s17_s13, 32  ;;  %p149_p4 = scmp.lt.s32.totalorder %s17_s13, %s17_s13 }
   0x9   :  { %p145_p3 = scmp.ne.s32.totalorder %s17_s13, %s144_s21  ;;  %p150_p5 = scmp.lt.s32.totalorder %s144_s21, %s144_s21 }
   0xb   :  { %p151_p6 = por %p150_p5, %p149_p4 }
   0xd   :  { %p152_p7 = pnand %p151_p6, %p145_p3 }
   0xf   :  { %155 = shalt.err (!%p152_p7)
}
  0x10   :  { %19 = dma.hbm_to_vmem [thread:$0]  %s239_s0, 32, %s17_s13, [#allocation3]  }
  0x11   :  { %178 = dma.done.wait [#allocation3], 32  }
  0x12   :  { %179 = vsyncadd [#allocation3], 4294967264  ;;  %v183_v0 = vmov 1   ;;  %v27_v1 = vld [vmem:[#allocation2] sm:$0x3]  ;;  %v184_v4 = vmov 0   ;;  %v68_v6 = vlaneseq }
  0x13   :  { %126 = vset.pattern.permute.xlu1 %v183_v0  ;;  %128 = vtanh.f32 %v27_v1  ;;  %v62_v10 = vld [vmem:[%s240_s1] sm:$0x3]  ;;  %vm91_vm0 = vcmask 25600   ;;  %s185_s1 = smov [#allocation5]  }
  0x14   :  { %v69_v7 = vshrl.u32 %v68_v6, 7  ;;  %v119_v17 = vld [vmem:[%s241_s2] ss:$0 sm:$0xff]  ;;  %s110_s27 = sshll.u32 %s185_s1, 4  ;;  %s111_s27 = int_to_ptr.vmem [resolvable:$true] %s110_s27 }
  0x15   :  { %s156_s2 = scalar_lea.vmem %s111_s27, 32  ;;  %p161_p9 = scmp.lt.s32.totalorder %s111_s27, %s111_s27 }
  0x16   :  { %v79_v8 = vsub.s32 1, %v69_v7  ;;  %v70_v9 = vsub.s32 0, %v69_v7  ;;  %p157_p8 = scmp.ne.s32.totalorder %s111_s27, %s156_s2  ;;  %p162_p10 = scmp.lt.s32.totalorder %s156_s2, %s156_s2 }
  0x18   :  { %v80_v11 = vrot.slane %v62_v10, %v79_v8  ;;  %v71_v12 = vrot.slane %v62_v10, %v70_v9  ;;  %p163_p11 = por %p162_p10, %p161_p9 }
  0x1a   :  { %p164_p12 = pnand %p163_p11, %p157_p8 }
  0x1d   :  { %v129_v2 = vpop.eup %128 }
  0x1e   :  { %v29_v3 = vmax.f32 %v129_v2, 0.0 }
  0x20   :  { %30 = vxpose.xlu0.b32.start.end [1/1] (short) (narrow) %v29_v3, 8 }
  0x49   :  { %125 = vset.pattern.permute.xlu0 %v184_v4 }
  0xa0   :  { %v46_v5 = vpop.trf.xlu0 }
  0xa1   :  { %74 = vperm.xlu1 %126, %v46_v5   ;;  %65 = vperm.xlu0 %125, %v46_v5  }
  0xa5   :  { %127 = vset.pattern.permute.xlu0 %v183_v0 }
 0x120   :  { %v75_v13 = vpop.permute.xlu1 %74  ;;  %v66_v14 = vpop.permute.xlu0 %65 }
 0x121   :  { %v81_v15 = vmul.f32 %v80_v11, %v75_v13  ;;  %v72_v16 = vmul.f32 %v71_v12, %v66_v14 }
 0x123   :  { %v82_v18 = vadd.f32 %v81_v15, %v72_v16 }
 0x125   :  { %v90_v19 = vadd.f32 %v119_v17, %v82_v18 }
 0x127   :  { %v92_v20 = vsel %vm91_vm0, %v90_v19, -inf }
 0x128   :  { %93 = vmax.xlane.f32.xlu1 %v92_v20 }
 0x1b5   :  { %v94_v21 = vpop.xlane.xlu1 %93 }
 0x1b6   :  { %v95_v22 = vsub.f32 %v90_v19, %v94_v21 }
 0x1b8   :  { %v96_v23 = vmul.f32 1.442695, %v95_v22 }
 0x1ba   :  { %130 = vpow2.f32 %v96_v23 }
 0x1c4   :  { %v131_v24 = vpop.eup %130 }
 0x1c5   :  { %v98_v25 = vsel %vm91_vm0, %v131_v24, 0.0 }
 0x1c6   :  { %99 = vadd.xlane.f32.xlu1 %v98_v25 }
 0x253   :  { %v100_v26 = vpop.xlane.xlu1 %99 }
 0x254   :  { %132 = vrcp.f32 %v100_v26 }
 0x25e   :  { %v133_v27 = vpop.eup %132 }
 0x25f   :  { %v102_v28 = vmul.f32 %v133_v27, %v131_v24 }
 0x261   :  { %103 = vst.msk [vmem:[#allocation5] sm:$0x3] %vm91_vm0, %v102_v28 }
 0x262   :  { %167 = shalt.err (!%p164_p12)
}
 0x263   :  { %s168_s30 = scalar_lea.hbm %s242_s3, 32 }
 0x264   :  { %p169_p13 = scmp.ne.s32.totalorder %s242_s3, %s168_s30  ;;  %p172_p0 = scmp.lt.u32.totalorder %s168_s30, %s242_s3 }
 0x266   :  { %p174_p1 = pnand %p172_p0, %p169_p13 }
 0x268   :  { %177 = shalt.err (!%p174_p1)
}
 0x269   :  { %113 = dma.vmem_to_hbm [thread:$0]  %s111_s27, 32, %s242_s3, [#allocation4]  }
 0x26a   :  { %180 = dma.done.wait [#allocation4], 32  }
 0x26b   :  { %181 = vsyncadd [#allocation4], 4294967264 }
 0x26c   :  { %117 = vsyncpa [#allocation3], 1 }
 0x26d   :  { %118 = vsyncpa [#allocation4], 1 }

</bundles_post_ra>
